<compile_context>
chip_gen: v7x
topology: tpu7x:2x2x1
jax: 0.10.0
libtpu: 0.0.40
codegen_flags: <defaults>
</compile_context>

<pallas_src>
import jax
import jax.numpy as jnp
from jax.experimental import pallas as pl
from jax.experimental.pallas import tpu as pltpu

H1_PAD = 256   # hidden 190 padded to 2*128
OUT_PAD = 128  # output 10 padded to 128 (lane-dense stores)


def netfull_kernel(x_ref, w1_ref, b1_ref, w2_ref, b2_ref, out_ref):
    # x_ref:  (TB, 784) f32     w1_ref: (784, 256) bf16   b1_ref: (1, 256) f32
    # w2_ref: (256, 128) f32    b2_ref: (1, 128) f32      out_ref: (TB, 128) f32
    x = x_ref[...].astype(jnp.bfloat16)

    # Layer 1: Linear(784 -> 256padded) + tanh  (bf16 operands, f32 MXU accumulate)
    h = jnp.dot(x, w1_ref[...], preferred_element_type=jnp.float32) + b1_ref[...]
    h = jnp.tanh(h)  # pad columns: tanh(0) = 0, contribute nothing to layer 2

    # Layer 2: Linear(256padded -> 128padded); pad columns get bias -1e30
    logits = jnp.dot(h, w2_ref[...], preferred_element_type=jnp.float32) + b2_ref[...]

    # log_softmax along the feature axis (numerically stable; pad columns never win max)
    m = jnp.max(logits, axis=1, keepdims=True)
    shifted = logits - m
    lse = jnp.log(jnp.sum(jnp.exp(shifted), axis=1, keepdims=True))
    out_ref[...] = (shifted - lse).astype(out_ref.dtype)


def _round_up(n, m):
    return ((n + m - 1) // m) * m


def netfull_forward(x_nchw, w1, b1, w2, b2, *, batch_tile=256):
    """x_nchw: (B, 1, 28, 28) float32. Returns (B, 10) log-probabilities."""
    B = x_nchw.shape[0]
    flat = x_nchw.reshape(B, -1).astype(jnp.float32)  # same semantics as torch .view(B, -1)
    IN = flat.shape[1]   # 784
    H1 = w1.shape[1]     # 190
    OUT = w2.shape[1]    # 10

    # --- pad weights to lane-aligned shapes (in practice done once, offline) ---
    w1p = jnp.zeros((IN, H1_PAD), jnp.bfloat16).at[:, :H1].set(w1.astype(jnp.bfloat16))
    b1p = jnp.zeros((1, H1_PAD), jnp.float32).at[:, :H1].set(b1.reshape(1, H1))
    w2p = jnp.zeros((H1_PAD, OUT_PAD), jnp.float32).at[:H1, :OUT].set(w2)
    b2p = jnp.full((1, OUT_PAD), -1e30, jnp.float32).at[:, :OUT].set(b2.reshape(1, OUT))

    # --- pad batch to a multiple of the tile so every store is unmasked ---
    tb = min(batch_tile, _round_up(B, 8))          # small batches: don't over-pad
    nb = pl.cdiv(B, tb)
    Bp = nb * tb
    if Bp != B:
        flat = jnp.pad(flat, ((0, Bp - B), (0, 0)))

    cost = pl.CostEstimate(
        flops=2 * Bp * IN * H1_PAD + 2 * Bp * H1_PAD * OUT_PAD,
        transcendentals=Bp * (H1_PAD + OUT_PAD),
        bytes_accessed=Bp * IN * 4 + w1p.size * 2
        + (b1p.size + w2p.size + b2p.size) * 4 + Bp * OUT_PAD * 4,
    )

    out_padded = pl.pallas_call(
        netfull_kernel,
        out_shape=jax.ShapeDtypeStruct((Bp, OUT_PAD), jnp.float32),
        grid=(nb,),
        in_specs=[
            pl.BlockSpec((tb, IN), lambda i: (i, 0)),        # streamed activations
            pl.BlockSpec((IN, H1_PAD), lambda i: (0, 0)),    # resident weights
            pl.BlockSpec((1, H1_PAD), lambda i: (0, 0)),
            pl.BlockSpec((H1_PAD, OUT_PAD), lambda i: (0, 0)),
            pl.BlockSpec((1, OUT_PAD), lambda i: (0, 0)),
        ],
        out_specs=pl.BlockSpec((tb, OUT_PAD), lambda i: (i, 0)),
        compiler_params=pltpu.CompilerParams(
            dimension_semantics=("parallel",),   # shard batch tiles across TCs on v7x
            vmem_limit_bytes=32 << 20,
        ),
        cost_estimate=cost,
    )(flat, w1p, b1p, w2p, b2p)

    return out_padded[:B, :OUT]


def init_params(key):
    """Deterministic init matching the nn.Linear shapes (stored pre-transposed)."""
    k1, k2, k3, k4 = jax.random.split(key, 4)
    # PyTorch Linear weight is (out, in); we store the transpose (in, out) for the kernel.
    bound1 = 1.0 / (784.0 ** 0.5)
    bound2 = 1.0 / (190.0 ** 0.5)
    w1 = jax.random.uniform(k1, (784, 190), jnp.float32, -bound1, bound1)
    b1 = jax.random.uniform(k2, (1, 190), jnp.float32, -bound1, bound1)
    w2 = jax.random.uniform(k3, (190, 10), jnp.float32, -bound2, bound2)
    b2 = jax.random.uniform(k4, (1, 10), jnp.float32, -bound2, bound2)
    return w1, b1, w2, b2


if __name__ == "__main__":
    key = jax.random.PRNGKey(0)
    kx, kp = jax.random.split(key)

    B = 8
    x = jax.random.normal(kx, (B, 1, 28, 28), jnp.float32)  # NCHW, MNIST-like
    w1, b1, w2, b2 = init_params(kp)

    out = netfull_forward(x, w1, b1, w2, b2)
    out = jax.block_until_ready(out)
    assert out.shape == (B, 10)

    # Sanity check against pure-JAX f32 reference (tolerance loosened for the
    # bf16 layer-1 matmul operands).
    flat = x.reshape(B, -1)
    h = jnp.tanh(flat @ w1 + b1)
    logits = h @ w2 + b2
    ref = jax.nn.log_softmax(logits, axis=1)
    assert jnp.allclose(out, ref, atol=3e-2), float(jnp.max(jnp.abs(out - ref)))

    # log_softmax invariant: probabilities sum to 1.
    assert jnp.allclose(jnp.exp(out).sum(axis=1), 1.0, atol=1e-3)

    print("KERNEL_OK")
</pallas_src>

<mosaic_0001>
module attributes {stable_mosaic.version = 11 : i64} {
  func.func @netfull_kernel(%arg0: i32, %arg1: memref<8x784xf32, #tpu.memory_space<vmem>>, %arg2: memref<784x256xbf16, #tpu.memory_space<vmem>>, %arg3: memref<1x256xf32, #tpu.memory_space<vmem>>, %arg4: memref<256x128xf32, #tpu.memory_space<vmem>>, %arg5: memref<1x128xf32, #tpu.memory_space<vmem>>, %arg6: memref<8x128xf32, #tpu.memory_space<vmem>>) attributes {dimension_semantics = [#tpu.dimension_semantics<parallel>], iteration_bounds = array<i64: 1>, scalar_prefetch = 0 : i64, scratch_operands = 0 : i64, tpu.core_type = #tpu.core_type<tc>, window_params = [{transform_indices = @transform_0, window_bounds = array<i64: 8, 784>}, {pipeline_mode = #tpu.pipeline_mode<synchronous>, transform_indices = @transform_1, window_bounds = array<i64: 784, 256>}, {pipeline_mode = #tpu.pipeline_mode<synchronous>, transform_indices = @transform_2, window_bounds = array<i64: 1, 256>}, {pipeline_mode = #tpu.pipeline_mode<synchronous>, transform_indices = @transform_3, window_bounds = array<i64: 256, 128>}, {pipeline_mode = #tpu.pipeline_mode<synchronous>, transform_indices = @transform_4, window_bounds = array<i64: 1, 128>}, {transform_indices = @transform_5, window_bounds = array<i64: 8, 128>}]} {
    %c0 = arith.constant 0 : index
    %c0_0 = arith.constant 0 : index
    %0 = vector.load %arg1[%c0, %c0_0] : memref<8x784xf32, #tpu.memory_space<vmem>>, vector<8x784xf32>
    %1 = arith.truncf %0 : vector<8x784xf32> to vector<8x784xbf16>
    %c0_1 = arith.constant 0 : index
    %c0_2 = arith.constant 0 : index
    %2 = vector.load %arg2[%c0_1, %c0_2] : memref<784x256xbf16, #tpu.memory_space<vmem>>, vector<784x256xbf16>
    %cst = arith.constant dense<0.000000e+00> : vector<8x256xf32>
    %3 = tpu.matmul %1, %2, %cst {dimension_numbers = #tpu.dot_dimension_numbers<[1], [0], [0], [1], [0, 0, 1, 1], [], []>} : vector<8x784xbf16>, vector<784x256xbf16>, vector<8x256xf32> -> vector<8x256xf32>
    %c0_3 = arith.constant 0 : index
    %c0_4 = arith.constant 0 : index
    %4 = vector.load %arg3[%c0_3, %c0_4] : memref<1x256xf32, #tpu.memory_space<vmem>>, vector<1x256xf32>
    %5 = vector.broadcast %4 : vector<1x256xf32> to vector<8x256xf32>
    %6 = arith.addf %3, %5 : vector<8x256xf32>
    %7 = math.tanh %6 : vector<8x256xf32>
    %c0_5 = arith.constant 0 : index
    %c0_6 = arith.constant 0 : index
    %8 = vector.load %arg4[%c0_5, %c0_6] : memref<256x128xf32, #tpu.memory_space<vmem>>, vector<256x128xf32>
    %cst_7 = arith.constant dense<0.000000e+00> : vector<8x128xf32>
    %9 = tpu.matmul %7, %8, %cst_7 {dimension_numbers = #tpu.dot_dimension_numbers<[1], [0], [0], [1], [0, 0, 1, 1], [], []>} : vector<8x256xf32>, vector<256x128xf32>, vector<8x128xf32> -> vector<8x128xf32>
    %c0_8 = arith.constant 0 : index
    %c0_9 = arith.constant 0 : index
    %10 = vector.load %arg5[%c0_8, %c0_9] : memref<1x128xf32, #tpu.memory_space<vmem>>, vector<1x128xf32>
    %11 = vector.broadcast %10 : vector<1x128xf32> to vector<8x128xf32>
    %12 = arith.addf %9, %11 : vector<8x128xf32>
    %cst_10 = arith.constant dense<0xFF800000> : vector<8xf32>
    %13 = vector.multi_reduction <maximumf>, %12, %cst_10 [1] : vector<8x128xf32> to vector<8xf32>
    %14 = vector.shape_cast %13 : vector<8xf32> to vector<8x1xf32>
    %15 = vector.broadcast %14 : vector<8x1xf32> to vector<8x128xf32>
    %16 = arith.subf %12, %15 : vector<8x128xf32>
    %17 = math.exp %16 : vector<8x128xf32>
    %cst_11 = arith.constant dense<0.000000e+00> : vector<8xf32>
    %18 = vector.multi_reduction <add>, %17, %cst_11 [1] : vector<8x128xf32> to vector<8xf32>
    %19 = vector.shape_cast %18 : vector<8xf32> to vector<8x1xf32>
    %20 = math.log %19 : vector<8x1xf32>
    %21 = vector.broadcast %20 : vector<8x1xf32> to vector<8x128xf32>
    %22 = arith.subf %16, %21 : vector<8x128xf32>
    %c0_12 = arith.constant 0 : index
    %c0_13 = arith.constant 0 : index
    %23 = vector.load %arg6[%c0_12, %c0_13] : memref<8x128xf32, #tpu.memory_space<vmem>>, vector<8x128xf32>
    tpu.vector_store %arg6[%c0_12, %c0_13], %22 {strides = array<i32>} : memref<8x128xf32, #tpu.memory_space<vmem>>, vector<8x128xf32>,
    return
  }
  func.func @transform_0(%arg0: i32) -> (i32, i32) {
    %c0_i32 = arith.constant 0 : i32
    %c0_i32_0 = arith.constant 0 : i32
    return %arg0, %c0_i32 : i32, i32
  }
  func.func @transform_1(%arg0: i32) -> (i32, i32) {
    %c0_i32 = arith.constant 0 : i32
    %c0_i32_0 = arith.constant 0 : i32
    %c0_i32_1 = arith.constant 0 : i32
    return %c0_i32, %c0_i32_0 : i32, i32
  }
  func.func @transform_2(%arg0: i32) -> (i32, i32) {
    %c0_i32 = arith.constant 0 : i32
    %c0_i32_0 = arith.constant 0 : i32
    %c0_i32_1 = arith.constant 0 : i32
    return %c0_i32, %c0_i32_0 : i32, i32
  }
  func.func @transform_3(%arg0: i32) -> (i32, i32) {
    %c0_i32 = arith.constant 0 : i32
    %c0_i32_0 = arith.constant 0 : i32
    %c0_i32_1 = arith.constant 0 : i32
    return %c0_i32, %c0_i32_0 : i32, i32
  }
  func.func @transform_4(%arg0: i32) -> (i32, i32) {
    %c0_i32 = arith.constant 0 : i32
    %c0_i32_0 = arith.constant 0 : i32
    %c0_i32_1 = arith.constant 0 : i32
    return %c0_i32, %c0_i32_0 : i32, i32
  }
  func.func @transform_5(%arg0: i32) -> (i32, i32) {
    %c0_i32 = arith.constant 0 : i32
    %c0_i32_0 = arith.constant 0 : i32
    return %arg0, %c0_i32 : i32, i32
  }
}

</mosaic_0001>

<bundles_post_ra>
// kernel: tpu_custom_call.1
= control target key start
LH: loop header
LB: loop body
LE: loop exit
PB: predicated region body
PF: predicated region fallthrough
CT: control target
= control target key end

     0   :  { %10 = vsyncpa [#allocation3], 0  ;;  %s1511_s0 = inlined_call_operand.hbm [shape: f32[8,784], index: 0, kind: input, shape index: {}]   ;;  %s1512_s1 = inlined_call_operand.hbm [shape: bf16[784,256], index: 1, kind: input, shape index: {}]   ;;  %s1513_s2 = inlined_call_operand.vmem [shape: f32[1,256], index: 2, kind: input, shape index: {}]   ;;  %s1514_s3 = inlined_call_operand.hbm [shape: f32[256,128], index: 3, kind: input, shape index: {}]   ;;  %s1515_s4 = inlined_call_operand.vmem [shape: f32[1,128], index: 4, kind: input, shape index: {}]   ;;  %s1516_s5 = inlined_call_operand.hbm [shape: f32[8,128], index: 5, kind: output, shape index: {}]  }
   0x1   :  { %11 = vsyncpa [#allocation6], 0 }
   0x2   :  { %12 = vsyncpa [#allocation4], 0  ;;  %s1414_s18 = smov [#allocation5]   ;;  %s1320_s22 = scalar_lea.hbm %s1512_s1, 12544 }
   0x3   :  { %s28_s19 = sshll.u32 %s1414_s18, 4  ;;  %p1321_p0 = scmp.ne.s32.totalorder %s1512_s1, %s1320_s22  ;;  %s29_s19 = int_to_ptr.vmem [resolvable:$true] %s28_s19 }
   0x4   :  { %p1324_p1 = scmp.lt.u32.totalorder %s1320_s22, %s1512_s1 }
   0x6   :  { %p1326_p2 = pnand %p1324_p1, %p1321_p0 }
   0x8   :  { %1329 = shalt.err (!%p1326_p2)
}
   0x9   :  { %s1330_s27 = scalar_lea.vmem %s29_s19, 12544  ;;  %p1335_p4 = scmp.lt.s32.totalorder %s29_s19, %s29_s19 }
   0xa   :  { %p1331_p3 = scmp.ne.s32.totalorder %s29_s19, %s1330_s27  ;;  %p1336_p5 = scmp.lt.s32.totalorder %s1330_s27, %s1330_s27 }
   0xc   :  { %p1337_p6 = por %p1336_p5, %p1335_p4 }
   0xe   :  { %p1338_p7 = pnand %p1337_p6, %p1331_p3 }
  0x10   :  { %1341 = shalt.err (!%p1338_p7)
}
  0x11   :  { %s1415_s28 = smov 128   ;;  %s1416_s29 = smov 8  }
  0x12   :  { %34 = dma.hbm_to_vmem [thread:$0]  %s1512_s1, 12544, %s29_s19, [#allocation6], %s1415_s28, %s1415_s28, %s1416_s29  }
  0x13   :  { %s1417_s7 = smov [#allocation2]   ;;  %s1418_s9 = smov [#allocation7]  }
  0x14   :  { %s19_s8 = sshll.u32 %s1417_s7, 4  ;;  %s42_s10 = sshll.u32 %s1418_s9, 4  ;;  %s20_s8 = int_to_ptr.vmem [resolvable:$true] %s19_s8  ;;  %s43_s10 = int_to_ptr.vmem [resolvable:$true] %s42_s10 }
  0x15   :  { %s1342_s13 = scalar_lea.hbm %s1511_s0, 896 }
  0x16   :  { %p1343_p8 = scmp.ne.s32.totalorder %s1511_s0, %s1342_s13  ;;  %p1346_p9 = scmp.lt.u32.totalorder %s1342_s13, %s1511_s0 }
  0x18   :  { %p1348_p10 = pnand %p1346_p9, %p1343_p8 }
  0x1a   :  { %1351 = shalt.err (!%p1348_p10)
}
  0x1b   :  { %s1352_s1 = scalar_lea.vmem %s20_s8, 896  ;;  %p1357_p12 = scmp.lt.s32.totalorder %s20_s8, %s20_s8 }
  0x1c   :  { %p1353_p11 = scmp.ne.s32.totalorder %s20_s8, %s1352_s1  ;;  %p1358_p13 = scmp.lt.s32.totalorder %s1352_s1, %s1352_s1 }
  0x1e   :  { %p1359_p0 = por %p1358_p13, %p1357_p12 }
  0x20   :  { %p1360_p1 = pnand %p1359_p0, %p1353_p11 }
  0x22   :  { %1363 = shalt.err (!%p1360_p1)
}
  0x23   :  { %22 = dma.hbm_to_vmem [thread:$0]  %s1511_s0, 896, %s20_s8, [#allocation3]  }
  0x24   :  { %s1364_s22 = scalar_lea.hbm %s1514_s3, 4096 }
  0x25   :  { %p1365_p2 = scmp.ne.s32.totalorder %s1514_s3, %s1364_s22  ;;  %p1368_p3 = scmp.lt.u32.totalorder %s1364_s22, %s1514_s3 }
  0x27   :  { %p1370_p4 = pnand %p1368_p3, %p1365_p2 }
  0x29   :  { %1373 = shalt.err (!%p1370_p4)
}
  0x2a   :  { %s1374_s27 = scalar_lea.vmem %s43_s10, 4096  ;;  %p1379_p6 = scmp.lt.s32.totalorder %s43_s10, %s43_s10 }
  0x2b   :  { %p1375_p5 = scmp.ne.s32.totalorder %s43_s10, %s1374_s27  ;;  %p1380_p7 = scmp.lt.s32.totalorder %s1374_s27, %s1374_s27 }
  0x2d   :  { %p1381_p8 = por %p1380_p7, %p1379_p6 }
  0x2f   :  { %p1382_p9 = pnand %p1381_p8, %p1375_p5 }
  0x31   :  { %1385 = shalt.err (!%p1382_p9)
}
  0x32   :  { %48 = dma.hbm_to_vmem [thread:$0]  %s1514_s3, 4096, %s43_s10, [#allocation6], %s1415_s28, %s1415_s28, %s1416_s29  }
  0x33   :  { %1408 = dma.done.wait [#allocation3], 896  }
  0x34   :  { %1409 = vsyncadd [#allocation3], 4294966400 }
  0x35   :  { %1410 = dma.done.wait [#allocation6], 16640  }
  0x36   :  { %1411 = vsyncadd [#allocation6], 4294950656  ;;  %v1165_v0 = vld [vmem:[#allocation5 + $0x104] ss:$8 sps:$4 sm:$0xff]   ;;  %v1167_v1 = vld [vmem:[#allocation5 + $0x100] ss:$8 sps:$4 sm:$0xff]  }
  0x37   :  { %720 = vmatprep.subr.bf16.mxu0 %v1165_v0  ;;  %v1168_v2 = vld [vmem:[#allocation5 + $0x114] ss:$8 sps:$4 sm:$0xff]   ;;  %v1170_v3 = vld [vmem:[#allocation5 + $0x110] ss:$8 sps:$4 sm:$0xff]   ;;  %v1171_v4 = vld [vmem:[#allocation5 + $0x124] ss:$8 sps:$4 sm:$0xff]  }
  0x38   :  { %721 = vmatpush1.bf16.msra.mxu0 %v1167_v1  ;;  %v1173_v5 = vld [vmem:[#allocation5 + $0x120] ss:$8 sps:$4 sm:$0xff]   ;;  %v1174_v6 = vld [vmem:[#allocation5 + $0x134] ss:$8 sps:$4 sm:$0xff]   ;;  %v1176_v7 = vld [vmem:[#allocation5 + $0x130] ss:$8 sps:$4 sm:$0xff]  }
  0x39   :  { %722 = vmatprep.subr.bf16.mxu0 %v1168_v2  ;;  %v1177_v8 = vld [vmem:[#allocation5 + $0x144] ss:$8 sps:$4 sm:$0xff]   ;;  %v1179_v9 = vld [vmem:[#allocation5 + $0x140] ss:$8 sps:$4 sm:$0xff]   ;;  %v1180_v10 = vld [vmem:[#allocation5 + $0x154] ss:$8 sps:$4 sm:$0xff]  }
  0x3a   :  { %v1182_v11 = vld [vmem:[#allocation5 + $0x150] ss:$8 sps:$4 sm:$0xff]   ;;  %v1207_v12 = vld [vmem:[#allocation5 + $0x4] ss:$8 sps:$4 sm:$0xff]   ;;  %v1209_v13 = vld [vmem:[#allocation5] ss:$8 sps:$4 sm:$0xff]  }
  0x3b   :  { %v1183_v14 = vld [vmem:[#allocation5 + $0x164] ss:$8 sps:$4 sm:$0xff]   ;;  %679 = vmatprep.subr.bf16.mxu1 %v1207_v12  ;;  %v1213_v15 = vld [vmem:[#allocation5 + $0x14] ss:$8 sps:$4 sm:$0xff]   ;;  %v1215_v16 = vld [vmem:[#allocation5 + $0x10] ss:$8 sps:$4 sm:$0xff]  }
  0x3c   :  { %723 = vmatpush1.bf16.msra.mxu0 %v1170_v3  ;;  %680 = vmatpush1.bf16.msra.mxu1 %v1209_v13  ;;  %v1185_v17 = vld [vmem:[#allocation5 + $0x160] ss:$8 sps:$4 sm:$0xff]   ;;  %v1186_v18 = vld [vmem:[#allocation5 + $0x174] ss:$8 sps:$4 sm:$0xff]   ;;  %v1219_v19 = vld [vmem:[#allocation5 + $0x24] ss:$8 sps:$4 sm:$0xff]  }
  0x3d   :  { %724 = vmatprep.subr.bf16.mxu0 %v1171_v4  ;;  %681 = vmatprep.subr.bf16.mxu1 %v1213_v15  ;;  %v64_v20 = vld [vmem:[#allocation2 + $0x18] sm:$0xff]  ;;  %v1188_v23 = vld [vmem:[#allocation5 + $0x170] ss:$8 sps:$4 sm:$0xff]   ;;  %v1225_v25 = vld [vmem:[#allocation5 + $0x34] ss:$8 sps:$4 sm:$0xff]   ;;  %vm675_vm0 = vcmask 130048  }
  0x3e   :  { %v1221_v21 = vld [vmem:[#allocation5 + $0x20] ss:$8 sps:$4 sm:$0xff]   ;;  %v71_v22 = vpack.c.bf16 %v64_v20, %v64_v20  ;;  %v1189_v24 = vld [vmem:[#allocation5 + $0x184] ss:$8 sps:$4 sm:$0xff]   ;;  %v1227_v27 = vld [vmem:[#allocation5 + $0x30] ss:$8 sps:$4 sm:$0xff]  }
  0x3f   :  { %v1191_v26 = vld [vmem:[#allocation5 + $0x180] ss:$8 sps:$4 sm:$0xff]   ;;  %v1231_v28 = vld [vmem:[#allocation5 + $0x44] ss:$8 sps:$4 sm:$0xff]   ;;  %v1192_v29 = vld [vmem:[#allocation5 + $0x194] ss:$8 sps:$4 sm:$0xff]  }
  0x40   :  { %725 = vmatpush1.bf16.msra.mxu0 %v1173_v5  ;;  %682 = vmatpush1.bf16.msra.mxu1 %v1215_v16  ;;  %v1194_v30 = vld [vmem:[#allocation5 + $0x190] ss:$8 sps:$4 sm:$0xff]   ;;  %v1233_v31 = vld [vmem:[#allocation5 + $0x40] ss:$8 sps:$4 sm:$0xff]   ;;  %v1237_v32 = vld [vmem:[#allocation5 + $0x54] ss:$8 sps:$4 sm:$0xff]  }
  0x41   :  { %726 = vmatprep.subr.bf16.mxu0 %v1174_v6  ;;  %683 = vmatprep.subr.bf16.mxu1 %v1219_v19  ;;  %v1195_v33 = vld [vmem:[#allocation5 + $0x1a4] ss:$8 sps:$4 sm:$0xff]   ;;  %v1197_v34 = vld [vmem:[#allocation5 + $0x1a0] ss:$8 sps:$4 sm:$0xff]   ;;  %v1239_v35 = vld [vmem:[#allocation5 + $0x50] ss:$8 sps:$4 sm:$0xff]  }
  0x42   :  { %752 = vmatprep.mubr.bf16.mxu0 %v71_v22  ;;  %v1243_v36 = vld [vmem:[#allocation5 + $0x64] ss:$8 sps:$4 sm:$0xff]   ;;  %v1198_v37 = vld [vmem:[#allocation5 + $0x1b4] ss:$8 sps:$4 sm:$0xff]   ;;  %v1200_v38 = vld [vmem:[#allocation5 + $0x1b0] ss:$8 sps:$4 sm:$0xff]  }
  0x43   :  { %v1245_v39 = vld [vmem:[#allocation5 + $0x60] ss:$8 sps:$4 sm:$0xff]   ;;  %v1249_v40 = vld [vmem:[#allocation5 + $0x74] ss:$8 sps:$4 sm:$0xff]   ;;  %v1201_v41 = vld [vmem:[#allocation5 + $0x1c4] ss:$8 sps:$4 sm:$0xff]  }
  0x44   :  { %727 = vmatpush1.bf16.msra.mxu0 %v1176_v7  ;;  %684 = vmatpush1.bf16.msra.mxu1 %v1221_v21  ;;  %v1203_v42 = vld [vmem:[#allocation5 + $0x1c0] ss:$8 sps:$4 sm:$0xff]   ;;  %v1251_v43 = vld [vmem:[#allocation5 + $0x70] ss:$8 sps:$4 sm:$0xff]   ;;  %v1255_v44 = vld [vmem:[#allocation5 + $0x84] ss:$8 sps:$4 sm:$0xff]  }
  0x45   :  { %728 = vmatprep.subr.bf16.mxu0 %v1177_v8  ;;  %685 = vmatprep.subr.bf16.mxu1 %v1225_v25  ;;  %v1204_v45 = vld [vmem:[#allocation5 + $0x1d4] ss:$8 sps:$4 sm:$0xff]   ;;  %v1206_v46 = vld [vmem:[#allocation5 + $0x1d0] ss:$8 sps:$4 sm:$0xff]   ;;  %v1257_v47 = vld [vmem:[#allocation5 + $0x80] ss:$8 sps:$4 sm:$0xff]  }
  0x46   :  { %v1261_v48 = vld [vmem:[#allocation5 + $0x94] ss:$8 sps:$4 sm:$0xff]   ;;  %v1210_v49 = vld [vmem:[#allocation5 + $0x1e4] ss:$8 sps:$4 sm:$0xff]   ;;  %v1212_v50 = vld [vmem:[#allocation5 + $0x1e0] ss:$8 sps:$4 sm:$0xff]  }
  0x47   :  { %v1263_v51 = vld [vmem:[#allocation5 + $0x90] ss:$8 sps:$4 sm:$0xff]   ;;  %v1267_v52 = vld [vmem:[#allocation5 + $0xa4] ss:$8 sps:$4 sm:$0xff]   ;;  %v1216_v53 = vld [vmem:[#allocation5 + $0x1f4] ss:$8 sps:$4 sm:$0xff]  }
  0x48   :  { %729 = vmatpush1.bf16.msra.mxu0 %v1179_v9  ;;  %686 = vmatpush1.bf16.msra.mxu1 %v1227_v27  ;;  %v1218_v54 = vld [vmem:[#allocation5 + $0x1f0] ss:$8 sps:$4 sm:$0xff]   ;;  %v1269_v56 = vld [vmem:[#allocation5 + $0xa0] ss:$8 sps:$4 sm:$0xff]   ;;  %v1273_v57 = vld [vmem:[#allocation5 + $0xb4] ss:$8 sps:$4 sm:$0xff]  }
  0x49   :  { %730 = vmatprep.subr.bf16.mxu0 %v1180_v10  ;;  %687 = vmatprep.subr.bf16.mxu1 %v1231_v28  ;;  %v63_v55 = vld [vmem:[#allocation2 + $0x10] sm:$0xff]  ;;  %v1224_v58 = vld [vmem:[#allocation5 + $0x204] ss:$8 sps:$4 sm:$0xff]   ;;  %v62_v61 = vld [vmem:[#allocation2 + $0x8] sm:$0xff]  ;;  %v1419_v28 = vmov 0   ;;  %s1420_s6 = smov [#allocation8]  }
  0x4a   :  { %v70_v59 = vpack.c.bf16 %v63_v55, %v63_v55  ;;  %v1275_v60 = vld [vmem:[#allocation5 + $0xb0] ss:$8 sps:$4 sm:$0xff]   ;;  %v1222_v62 = vld [vmem:[#allocation5 + $0x200] ss:$8 sps:$4 sm:$0xff]   ;;  %v1279_v63 = vld [vmem:[#allocation5 + $0xc4] ss:$8 sps:$4 sm:$0xff]   ;;  %v69_v0 = vpack.c.bf16 %v62_v61, %v62_v61 }
  0x4b   :  { %v1230_v1 = vld [vmem:[#allocation5 + $0x214] ss:$8 sps:$4 sm:$0xff]   ;;  %v1281_v2 = vld [vmem:[#allocation5 + $0xc0] ss:$8 sps:$4 sm:$0xff]   ;;  %v1228_v4 = vld [vmem:[#allocation5 + $0x210] ss:$8 sps:$4 sm:$0xff]  }
  0x4c   :  { %731 = vmatpush1.bf16.msra.mxu0 %v1182_v11  ;;  %688 = vmatpush1.bf16.msra.mxu1 %v1233_v31  ;;  %v66_v3 = vld [vmem:[#allocation2 + $0x28] sm:$0xff]  ;;  %v1236_v7 = vld [vmem:[#allocation5 + $0x224] ss:$8 sps:$4 sm:$0xff]   ;;  %v1234_v9 = vld [vmem:[#allocation5 + $0x220] ss:$8 sps:$4 sm:$0xff]   ;;  %s971_s7 = sshll.u32 %s1420_s6, 4  ;;  %s972_s7 = int_to_ptr.vmem [resolvable:$true] %s971_s7 }
  0x4d   :  { %732 = vmatprep.subr.bf16.mxu0 %v1183_v14  ;;  %689 = vmatprep.subr.bf16.mxu1 %v1237_v32  ;;  %v1285_v5 = vld [vmem:[#allocation5 + $0xd4] ss:$8 sps:$4 sm:$0xff]   ;;  %v73_v6 = vpack.c.bf16 %v66_v3, %v66_v3  ;;  %v1287_v8 = vld [vmem:[#allocation5 + $0xd0] ss:$8 sps:$4 sm:$0xff]   ;;  %v1291_v10 = vld [vmem:[#allocation5 + $0xe4] ss:$8 sps:$4 sm:$0xff]   ;;  %p1391_p11 = scmp.lt.s32.totalorder %s972_s7, %s972_s7 }
  0x4e   :  { %711 = vmatprep.mubr.bf16.mxu1 %v69_v0  ;;  %v1242_v11 = vld [vmem:[#allocation5 + $0x234] ss:$8 sps:$4 sm:$0xff]   ;;  %v1293_v12 = vld [vmem:[#allocation5 + $0xe0] ss:$8 sps:$4 sm:$0xff]   ;;  %v1240_v13 = vld [vmem:[#allocation5 + $0x230] ss:$8 sps:$4 sm:$0xff]  }
  0x4f   :  { %v1297_v14 = vld [vmem:[#allocation5 + $0xf4] ss:$8 sps:$4 sm:$0xff]   ;;  %v1248_v15 = vld [vmem:[#allocation5 + $0x244] ss:$8 sps:$4 sm:$0xff]   ;;  %v1299_v16 = vld [vmem:[#allocation5 + $0xf0] ss:$8 sps:$4 sm:$0xff]  }
  0x50   :  { %733 = vmatpush1.bf16.msra.mxu0 %v1185_v17  ;;  %690 = vmatpush1.bf16.msra.mxu1 %v1239_v35  ;;  %v61_v17 = vld [vmem:[#allocation2] sm:$0xff]  ;;  %v1254_v20 = vld [vmem:[#allocation5 + $0x254] ss:$8 sps:$4 sm:$0xff]   ;;  %v1252_v25 = vld [vmem:[#allocation5 + $0x250] ss:$8 sps:$4 sm:$0xff]   ;;  %s1386_s8 = scalar_lea.vmem %s972_s7, 128 }
  0x51   :  { %734 = vmatprep.subr.bf16.mxu0 %v1186_v18  ;;  %691 = vmatprep.subr.bf16.mxu1 %v1243_v36  ;;  %v1246_v18 = vld [vmem:[#allocation5 + $0x240] ss:$8 sps:$4 sm:$0xff]   ;;  %v1308_v19 = vld [vmem:[#allocation5 + $0x304] ss:$8 sps:$4 sm:$0xff]   ;;  %v861_v21 = vld [vmem:[#allocation7 + $0x80] sm:$0xff]  ;;  %p1387_p10 = scmp.ne.s32.totalorder %s972_s7, %s1386_s8  ;;  %p1392_p12 = scmp.lt.s32.totalorder %s1386_s8, %s1386_s8 }
  0x52   :  { %v862_v22 = vld [vmem:[#allocation7 + $0x88] sm:$0xff]  ;;  %v1260_v27 = vld [vmem:[#allocation5 + $0x264] ss:$8 sps:$4 sm:$0xff]   ;;  %v845_v31 = vld [vmem:[#allocation7] sm:$0xff] }
  0x53   :  { %v846_v32 = vld [vmem:[#allocation7 + $0x8] sm:$0xff]  ;;  %v864_v35 = vld [vmem:[#allocation7 + $0x98] sm:$0xff]  ;;  %v865_v61 = vld [vmem:[#allocation7 + $0xa0] sm:$0xff]  ;;  %p1393_p13 = por %p1392_p12, %p1391_p11 }
  0x54   :  { %735 = vmatpush1.bf16.msra.mxu0 %v1188_v23  ;;  %692 = vmatpush1.bf16.msra.mxu1 %v1245_v39  ;;  %v68_v23 = vpack.c.bf16 %v61_v17, %v61_v17  ;;  %v1309_v55 = vld [vmem:[#allocation5 + $0x2f0] ss:$8 sps:$4 sm:$0xff]   ;;  %v868_v3 = vld [vmem:[#allocation7 + $0xb8] sm:$0xff] }
  0x55   :  { %736 = vmatprep.subr.bf16.mxu0 %v1189_v24  ;;  %693 = vmatprep.subr.bf16.mxu1 %v1249_v40  ;;  %v1306_v24 = vld [vmem:[#allocation5 + $0x300] ss:$8 sps:$4 sm:$0xff]   ;;  %v1272_v40 = vld [vmem:[#allocation5 + $0x284] ss:$8 sps:$4 sm:$0xff]   ;;  %p1394_p0 = pnand %p1393_p13, %p1387_p10 }
  0x58   :  { %737 = vmatpush1.bf16.msra.mxu0 %v1191_v26  ;;  %694 = vmatpush1.bf16.msra.mxu1 %v1251_v43  ;;  %v1116_v26 = vpack.c.bf16 %v862_v22, %v861_v21  ;;  %v1276_v43 = vld [vmem:[#allocation5 + $0x290] ss:$8 sps:$4 sm:$0xff]  }
  0x59   :  { %738 = vmatprep.subr.bf16.mxu0 %v1192_v29  ;;  %695 = vmatprep.subr.bf16.mxu1 %v1255_v44  ;;  %v67_v29 = vld [vmem:[#allocation2 + $0x30] sm:$0xff]  ;;  %v1284_v44 = vld [vmem:[#allocation5 + $0x2a4] ss:$8 sps:$4 sm:$0xff]   ;;  %v873_v21 = vld [vmem:[#allocation7 + $0xe0] sm:$0xff] }
  0x5a   :  { %v74_v36 = vpack.c.bf16 %v67_v29, %v67_v29  ;;  %v874_v22 = vld [vmem:[#allocation7 + $0xe8] sm:$0xff] }
  0x5c   :  { %739 = vmatpush1.bf16.msra.mxu0 %v1194_v30  ;;  %696 = vmatpush1.bf16.msra.mxu1 %v1257_v47  ;;  %v1258_v30 = vld [vmem:[#allocation5 + $0x260] ss:$8 sps:$4 sm:$0xff]   ;;  %v1288_v47 = vld [vmem:[#allocation5 + $0x2b0] ss:$8 sps:$4 sm:$0xff]  }
  0x5d   :  { %740 = vmatprep.subr.bf16.mxu0 %v1195_v33  ;;  %697 = vmatprep.subr.bf16.mxu1 %v1261_v48  ;;  %v1266_v33 = vld [vmem:[#allocation5 + $0x274] ss:$8 sps:$4 sm:$0xff]   ;;  %v1296_v48 = vld [vmem:[#allocation5 + $0x2c4] ss:$8 sps:$4 sm:$0xff]  }
  0x60   :  { %741 = vmatpush1.bf16.msra.mxu0 %v1197_v34  ;;  %698 = vmatpush1.bf16.msra.mxu1 %v1263_v51  ;;  %v863_v34 = vld [vmem:[#allocation7 + $0x90] sm:$0xff]  ;;  %v1300_v51 = vld [vmem:[#allocation5 + $0x2d0] ss:$8 sps:$4 sm:$0xff]  }
  0x61   :  { %742 = vmatprep.subr.bf16.mxu0 %v1198_v37  ;;  %699 = vmatprep.subr.bf16.mxu1 %v1267_v52  ;;  %v1118_v37 = vpack.c.bf16 %v846_v32, %v845_v31  ;;  %v1120_v39 = vpack.c.bf16 %v864_v35, %v863_v34  ;;  %v1305_v52 = vld [vmem:[#allocation5 + $0x2e4] ss:$8 sps:$4 sm:$0xff]  }
  0x62   :  { %v860_v31 = vld [vmem:[#allocation7 + $0x78] sm:$0xff] }
  0x64   :  { %743 = vmatpush1.bf16.msra.mxu0 %v1200_v38  ;;  %700 = vmatpush1.bf16.msra.mxu1 %v1269_v56  ;;  %v1264_v38 = vld [vmem:[#allocation5 + $0x270] ss:$8 sps:$4 sm:$0xff]   ;;  %v65_v56 = vld [vmem:[#allocation2 + $0x20] sm:$0xff] }
  0x65   :  { %744 = vmatprep.subr.bf16.mxu0 %v1201_v41  ;;  %701 = vmatprep.subr.bf16.mxu1 %v1273_v57  ;;  %v1270_v41 = vld [vmem:[#allocation5 + $0x280] ss:$8 sps:$4 sm:$0xff]   ;;  %v72_v57 = vpack.c.bf16 %v65_v56, %v65_v56 }
  0x68   :  { %745 = vmatpush1.bf16.msra.mxu0 %v1203_v42  ;;  %702 = vmatpush1.bf16.msra.mxu1 %v1275_v60  ;;  %v1278_v42 = vld [vmem:[#allocation5 + $0x294] ss:$8 sps:$4 sm:$0xff]  }
  0x69   :  { %746 = vmatprep.subr.bf16.mxu0 %v1204_v45  ;;  %703 = vmatprep.subr.bf16.mxu1 %v1279_v63  ;;  %v1282_v45 = vld [vmem:[#allocation5 + $0x2a0] ss:$8 sps:$4 sm:$0xff]   ;;  %v849_v63 = vld [vmem:[#allocation7 + $0x20] sm:$0xff] }
  0x6c   :  { %747 = vmatpush1.bf16.msra.mxu0 %v1206_v46  ;;  %704 = vmatpush1.bf16.msra.mxu1 %v1281_v2  ;;  %v1290_v46 = vld [vmem:[#allocation5 + $0x2b4] ss:$8 sps:$4 sm:$0xff]   ;;  %v867_v2 = vld [vmem:[#allocation7 + $0xb0] sm:$0xff] }
  0x6d   :  { %748 = vmatprep.subr.bf16.mxu0 %v1210_v49  ;;  %705 = vmatprep.subr.bf16.mxu1 %v1285_v5  ;;  %v1294_v49 = vld [vmem:[#allocation5 + $0x2c0] ss:$8 sps:$4 sm:$0xff]   ;;  %v1128_v5 = vpack.c.bf16 %v868_v3, %v867_v2 }
  0x70   :  { %749 = vmatpush1.bf16.msra.mxu0 %v1212_v50  ;;  %706 = vmatpush1.bf16.msra.mxu1 %v1287_v8  ;;  %v1302_v50 = vld [vmem:[#allocation5 + $0x2d4] ss:$8 sps:$4 sm:$0xff]  }
  0x71   :  { %750 = vmatprep.subr.bf16.mxu0 %v1216_v53  ;;  %707 = vmatprep.subr.bf16.mxu1 %v1291_v10  ;;  %v1303_v53 = vld [vmem:[#allocation5 + $0x2e0] ss:$8 sps:$4 sm:$0xff]   ;;  %v870_v10 = vld [vmem:[#allocation7 + $0xc8] sm:$0xff] }
  0x74   :  { %751 = vmatpush1.bf16.msra.mxu0 %v1218_v54  ;;  %708 = vmatpush1.bf16.msra.mxu1 %v1293_v12  ;;  %v1311_v54 = vld [vmem:[#allocation5 + $0x2f4] ss:$8 sps:$4 sm:$0xff]  }
  0x75   :  { %761 = vmatprep.subr.bf16.mxu0 %v1224_v58  ;;  %709 = vmatprep.subr.bf16.mxu1 %v1297_v14  ;;  %v847_v58 = vld [vmem:[#allocation7 + $0x10] sm:$0xff]  ;;  %v853_v12 = vld [vmem:[#allocation7 + $0x40] sm:$0xff] }
  0x77   :  { %753 = vmatmul.mubr.bf16.vlgmr.msra.gmra.mrb[0].mxu0 %v70_v59  ;;  %v848_v59 = vld [vmem:[#allocation7 + $0x18] sm:$0xff] }
  0x78   :  { %762 = vmatpush1.bf16.msra.mxu0 %v1222_v62  ;;  %793 = vmatprep.mubr.bf16.mxu0 %v73_v6  ;;  %v1122_v60 = vpack.c.bf16 %v848_v59, %v847_v58  ;;  %v866_v62 = vld [vmem:[#allocation7 + $0xa8] sm:$0xff]  ;;  %v851_v6 = vld [vmem:[#allocation7 + $0x30] sm:$0xff] }
  0x79   :  { %763 = vmatprep.subr.bf16.mxu0 %v1230_v1  ;;  %710 = vmatpush1.bf16.msra.mxu1 %v1299_v16  ;;  %v1124_v0 = vpack.c.bf16 %v866_v62, %v865_v61  ;;  %v850_v1 = vld [vmem:[#allocation7 + $0x28] sm:$0xff]  ;;  %v872_v16 = vld [vmem:[#allocation7 + $0xd8] sm:$0xff] }
  0x7a   :  { %802 = vmatprep.subr.bf16.mxu1 %v1308_v19  ;;  %v856_v19 = vld [vmem:[#allocation7 + $0x58] sm:$0xff] }
  0x7b   :  { %v1080_v62 = vld [vmem:[%s1515_s4] ss:$0 sm:$0xff] }
  0x7c   :  { %764 = vmatpush1.bf16.msra.mxu0 %v1228_v4  ;;  %712 = vmatmul.mubr.bf16.vlgmr.msra.gmra.mrb[0].mxu1 %v68_v23  ;;  %v1126_v4 = vpack.c.bf16 %v850_v1, %v849_v63  ;;  %v857_v23 = vld [vmem:[#allocation7 + $0x60] sm:$0xff] }
  0x7d   :  { %765 = vmatprep.subr.bf16.mxu0 %v1236_v7  ;;  %803 = vmatpush1.bf16.msra.mxu1 %v1306_v24  ;;  %v852_v7 = vld [vmem:[#allocation7 + $0x38] sm:$0xff]  ;;  %v1140_v24 = vpack.c.bf16 %v874_v22, %v873_v21 }
  0x7e   :  { %834 = vmatprep.mubr.bf16.mxu1 %v1419_v28  ;;  %1117 = vmatprep.subr.bf16.mxu1 %v1116_v26  ;;  %v1130_v8 = vpack.c.bf16 %v852_v7, %v851_v6  ;;  %v875_v26 = vld [vmem:[#allocation7 + $0xf0] sm:$0xff] }
  0x80   :  { %766 = vmatpush1.bf16.msra.mxu0 %v1234_v9  ;;  %v869_v9 = vld [vmem:[#allocation7 + $0xc0] sm:$0xff] }
  0x81   :  { %767 = vmatprep.subr.bf16.mxu0 %v1242_v11  ;;  %v1132_v11 = vpack.c.bf16 %v870_v10, %v869_v9 }
  0x84   :  { %768 = vmatpush1.bf16.msra.mxu0 %v1240_v13  ;;  %1079 = vmatmul.mubr.msk.bf16.vlgmr.msra.gmra.mrb[4].mxu1 %vm675_vm0, %v74_v36  ;;  %v854_v13 = vld [vmem:[#allocation7 + $0x48] sm:$0xff] }
  0x85   :  { %769 = vmatprep.subr.bf16.mxu0 %v1248_v15  ;;  %1119 = vmatpush3.bf16.msra.mxu1 %v1118_v37  ;;  %v1134_v14 = vpack.c.bf16 %v854_v13, %v853_v12  ;;  %v871_v15 = vld [vmem:[#allocation7 + $0xd0] sm:$0xff] }
  0x86   :  { %1121 = vmatprep.subr.bf16.mxu1 %v1120_v39  ;;  %v1136_v17 = vpack.c.bf16 %v872_v16, %v871_v15 }
  0x88   :  { %770 = vmatpush1.bf16.msra.mxu0 %v1246_v18  ;;  %v855_v18 = vld [vmem:[#allocation7 + $0x50] sm:$0xff] }
  0x89   :  { %771 = vmatprep.subr.bf16.mxu0 %v1254_v20  ;;  %1123 = vmatpush3.bf16.msra.mxu1 %v1122_v60  ;;  %v1138_v20 = vpack.c.bf16 %v856_v19, %v855_v18 }
  0x8a   :  { %1125 = vmatprep.subr.bf16.mxu1 %v1124_v0 }
  0x8c   :  { %772 = vmatpush1.bf16.msra.mxu0 %v1252_v25  ;;  %v858_v25 = vld [vmem:[#allocation7 + $0x68] sm:$0xff] }
  0x8d   :  { %773 = vmatprep.subr.bf16.mxu0 %v1260_v27  ;;  %1127 = vmatpush3.bf16.msra.mxu1 %v1126_v4  ;;  %v876_v27 = vld [vmem:[#allocation7 + $0xf8] sm:$0xff]  ;;  %v1142_v28 = vpack.c.bf16 %v858_v25, %v857_v23 }
  0x8e   :  { %1129 = vmatprep.subr.bf16.mxu1 %v1128_v5  ;;  %v1144_v29 = vpack.c.bf16 %v876_v27, %v875_v26 }
  0x90   :  { %774 = vmatpush1.bf16.msra.mxu0 %v1258_v30  ;;  %v859_v30 = vld [vmem:[#allocation7 + $0x70] sm:$0xff] }
  0x91   :  { %775 = vmatprep.subr.bf16.mxu0 %v1266_v33  ;;  %1131 = vmatpush3.bf16.msra.mxu1 %v1130_v8  ;;  %v1146_v32 = vpack.c.bf16 %v860_v31, %v859_v30 }
  0x92   :  { %1133 = vmatprep.subr.bf16.mxu1 %v1132_v11 }
  0x94   :  { %776 = vmatpush1.bf16.msra.mxu0 %v1264_v38 }
  0x95   :  { %777 = vmatprep.subr.bf16.mxu0 %v1272_v40  ;;  %1135 = vmatpush3.bf16.msra.mxu1 %v1134_v14 }
  0x96   :  { %1137 = vmatprep.subr.bf16.mxu1 %v1136_v17 }
  0x98   :  { %778 = vmatpush1.bf16.msra.mxu0 %v1270_v41  ;;  %v175_v41 = vlaneseq }
  0x99   :  { %779 = vmatprep.subr.bf16.mxu0 %v1278_v42  ;;  %1139 = vmatpush3.bf16.msra.mxu1 %v1138_v20 }
  0x9a   :  { %1141 = vmatprep.subr.bf16.mxu1 %v1140_v24  ;;  %v176_v42 = vshrl.u32 %v175_v41, 7 }
  0x9c   :  { %780 = vmatpush1.bf16.msra.mxu0 %v1276_v43  ;;  %v177_v43 = vsub.s32 0, %v176_v42 }
  0x9d   :  { %781 = vmatprep.subr.bf16.mxu0 %v1284_v44  ;;  %1143 = vmatpush3.bf16.msra.mxu1 %v1142_v28  ;;  %v173_v44 = vld [vmem:[%s1513_s2] sm:$0x3] }
  0x9e   :  { %1145 = vmatprep.subr.bf16.mxu1 %v1144_v29 }
  0xa0   :  { %782 = vmatpush1.bf16.msra.mxu0 %v1282_v45  ;;  %v181_v45 = vsub.s32 1, %v176_v42 }
  0xa1   :  { %783 = vmatprep.subr.bf16.mxu0 %v1290_v46  ;;  %1147 = vmatpush3.bf16.msra.mxu1 %v1146_v32  ;;  %v178_v46 = vrot.slane %v173_v44, %v177_v43 }
  0xa4   :  { %784 = vmatpush1.bf16.msra.mxu0 %v1288_v47  ;;  %v182_v47 = vrot.slane %v173_v44, %v181_v45 }
  0xa5   :  { %785 = vmatprep.subr.bf16.mxu0 %v1296_v48 }
  0xa8   :  { %786 = vmatpush1.bf16.msra.mxu0 %v1294_v49 }
  0xa9   :  { %787 = vmatprep.subr.bf16.mxu0 %v1302_v50 }
  0xac   :  { %788 = vmatpush1.bf16.msra.mxu0 %v1300_v51 }
  0xad   :  { %789 = vmatprep.subr.bf16.mxu0 %v1305_v52 }
  0xb0   :  { %790 = vmatpush1.bf16.msra.mxu0 %v1303_v53 }
  0xb1   :  { %791 = vmatprep.subr.bf16.mxu0 %v1311_v54 }
  0xb4   :  { %792 = vmatpush1.bf16.msra.mxu0 %v1309_v55 }
  0xb7   :  { %794 = vmatmul.mubr.bf16.vlgmr.msra.gmra.mrb[0].mxu0 %v72_v57 }
 0x14f   :  { %v713_v33 = vpop.f32.mrb[0].mxu1 }
 0x150   :  { %v715_v34 = vpop.f32.mrb[1].mxu1  ;;  %v714_v48 = vadd.f32 %v713_v33, %v178_v46 }
 0x151   :  { %v717_v35 = vpop.f32.mrb[2].mxu1  ;;  %v716_v49 = vadd.f32 %v715_v34, %v182_v47 }
 0x152   :  { %v718_v36 = vpop.f32.mrb[3].mxu1 }
 0x157   :  { %v836_v37 = vpop.f32.mrb[4].mxu1 }
 0x158   :  { %v838_v38 = vpop.f32.mrb[5].mxu1 }
 0x159   :  { %v840_v39 = vpop.f32.mrb[6].mxu1 }
 0x15a   :  { %v841_v40 = vpop.f32.mrb[7].mxu1 }
 0x18a   :  { %v795_v50 = vpop.f32.mrb[0].mxu0 }
 0x18b   :  { %v1149_v51 = vadd.f32 %v795_v50, %v714_v48  ;;  %v797_v52 = vpop.f32.mrb[1].mxu0 }
 0x18c   :  { %v1152_v53 = vadd.f32 %v797_v52, %v716_v49  ;;  %v799_v54 = vpop.f32.mrb[2].mxu0 }
 0x18d   :  { %v1150_v55 = vadd.f32 %v1149_v51, %v836_v37  ;;  %v800_v56 = vpop.f32.mrb[3].mxu0 }
 0x18e   :  { %v1153_v57 = vadd.f32 %v1152_v53, %v838_v38 }
 0x190   :  { %1312 = vtanh.f32 %v1153_v57 }
 0x191   :  { %1314 = vtanh.f32 %v1150_v55 }
 0x19a   :  { %v1313_v58 = vpop.eup %1312 }
 0x19b   :  { %v1315_v59 = vpop.eup %1314  ;;  %948 = vmatprep.mubr.f32.mxu1 %v1313_v58 }
 0x19c   :  { %949 = vmatmul.mubr.f32.vlgmr.msra.gmra.mrb[8].mxu1 %v1315_v59 }
 0x26f   :  { %v1113_v60 = vpop.f32.mrb[8].mxu1 }
 0x270   :  { %v1114_v61 = vpop.f32.mrb[9].mxu1 }
 0x271   :  { %v1115_v63 = vadd.f32 %v1114_v61, %v1113_v60 }
 0x273   :  { %v951_v0 = vadd.f32 %v1115_v63, %v1080_v62 }
 0x275   :  { %954 = vmax.xlane.f32.xlu0 %v951_v0 }
 0x302   :  { %v955_v1 = vpop.xlane.xlu0 %954 }
 0x303   :  { %v956_v2 = vsub.f32 %v951_v0, %v955_v1 }
 0x305   :  { %v957_v3 = vmul.f32 1.442695, %v956_v2 }
 0x307   :  { %1316 = vpow2.f32 %v957_v3 }
 0x311   :  { %v1317_v4 = vpop.eup %1316 }
 0x312   :  { %959 = vadd.xlane.f32.xlu0 %v1317_v4 }
 0x39f   :  { %v960_v5 = vpop.xlane.xlu0 %959 }
 0x3a0   :  { %1318 = vlog2.f32 %v960_v5 }
 0x3aa   :  { %v1319_v6 = vpop.eup %1318 }
 0x3ab   :  { %v962_v7 = vmul.f32 0.6931472, %v1319_v6 }
 0x3ad   :  { %v963_v8 = vsub.f32 %v956_v2, %v962_v7 }
 0x3af   :  { %964 = vst [vmem:[#allocation8] sm:$0xff] %v963_v8 }
 0x3b0   :  { %1397 = shalt.err (!%p1394_p0)
}
 0x3b1   :  { %s1398_s10 = scalar_lea.hbm %s1516_s5, 128 }
 0x3b2   :  { %p1399_p1 = scmp.ne.s32.totalorder %s1516_s5, %s1398_s10  ;;  %p1402_p2 = scmp.lt.u32.totalorder %s1398_s10, %s1516_s5 }
 0x3b4   :  { %p1404_p3 = pnand %p1402_p2, %p1399_p1 }
 0x3b6   :  { %1407 = shalt.err (!%p1404_p3)
}
 0x3b7   :  { %974 = dma.vmem_to_hbm [thread:$0]  %s972_s7, 128, %s1516_s5, [#allocation4]  }
 0x3b8   :  { %1412 = dma.done.wait [#allocation4], 128  }
 0x3b9   :  { %1413 = vsyncadd [#allocation4], 4294967168 }
 0x3ba   :  { %978 = vsyncpa [#allocation3], 1 }
 0x3bb   :  { %979 = vsyncpa [#allocation6], 1 }
 0x3bc   :  { %980 = vsyncpa [#allocation4], 1 }

</bundles_post_ra>
